<compile_context>
chip_gen: v7x
topology: tpu7x:2x2x1
jax: 0.10.0
libtpu: 0.0.40
codegen_flags: <defaults>
</compile_context>

<pallas_src>
import jax
import jax.numpy as jnp
from jax.experimental import pallas as pl
from jax.experimental.pallas import tpu as pltpu


def _cnn_kernel(x_ref, wce_ref, bconv_ref, wfc_ref, bfc_ref, out_ref):
    # x_ref    : (TB, L)     input signal block (f32)
    # wce_ref  : (L, C*L)    banded im2col conv matrix (compute dtype)
    # bconv_ref: (1, C*L)    conv bias, c-major flatten order (f32)
    # wfc_ref  : (C*L, L)    fc weight, transposed (compute dtype)
    # bfc_ref  : (1, L)      fc bias (f32)
    # out_ref  : (TB, L)
    cdt = wce_ref.dtype
    x = x_ref[...].astype(cdt)                                    # (TB, L)

    # ---- Conv1d(1->C, padding) + bias + ReLU: one MXU matmul ----
    h = jnp.dot(x, wce_ref[...], preferred_element_type=jnp.float32)
    h = jnp.maximum(h + bconv_ref[...], 0.0)                      # (TB, C*L) f32

    # ---- Linear(C*L -> L): second MXU matmul, f32 accumulation ----
    out = jnp.dot(h.astype(wfc_ref.dtype), wfc_ref[...],
                  preferred_element_type=jnp.float32)
    out_ref[...] = (out + bfc_ref[...]).astype(out_ref.dtype)     # (TB, L)


def pack_params(params, *, padding=1, compute_dtype=jnp.bfloat16):
    """One-time weight re-layout (hoisted out of the per-call wrapper)."""
    wconv, bconv, wfc, bfc = params          # (C,1,K), (C,), (L, C*L), (L,)
    C, _, K = wconv.shape
    L = wfc.shape[0]
    assert wfc.shape == (L, C * L)
    # fc input dim (C*L) requires conv output length == L  =>  K == 2*pad + 1
    assert L + 2 * padding - K + 1 == L, "kernel_size must be 2*padding + 1"

    # Banded im2col conv matrix: Wce[l_in, c*L + l_out] = wconv[c, 0, k]
    # where l_in == l_out + k - padding (zero outside the band => zero-pad conv).
    l_in = jnp.arange(L)[:, None]
    l_out = jnp.arange(L)[None, :]
    wce = jnp.zeros((L, C, L), jnp.float32)
    for k in range(K):                        # K is tiny & static
        band = (l_in == l_out + (k - padding)).astype(jnp.float32)   # (L, L)
        wce = wce + band[:, None, :] * wconv[None, :, 0, k, None]    # (L, C, L)
    wce = wce.reshape(L, C * L).astype(compute_dtype)                # (L, C*L)

    bconv_row = jnp.repeat(bconv.astype(jnp.float32), L).reshape(1, C * L)
    wfc2 = wfc.T.astype(compute_dtype)                               # (C*L, L)
    bfc_row = bfc.astype(jnp.float32).reshape(1, L)
    return wce, bconv_row, wfc2, bfc_row


def cnn_model_forward(x, packed_params, *, batch_tile=256):
    """x: (B, L, 1) float32 -> (B, L, 1) float32 (same as CNNModel.forward)."""
    wce, bconv_row, wfc2, bfc_row = packed_params
    B, L, _ = x.shape
    CL = wce.shape[1]

    x2 = x[..., 0]                                   # (B, L), layout-only

    # Batch tiling: tb <= batch_tile; multiple of 8 when the array is tiled.
    if B <= batch_tile:
        tb = B                                       # full-extent block is legal
    else:
        tb = max(8, (batch_tile // 8) * 8)
    Bp = pl.cdiv(B, tb) * tb
    if Bp != B:                                      # remainder block via zero-pad
        x2 = jnp.pad(x2, ((0, Bp - B), (0, 0)))
    grid = (Bp // tb,)

    # VMEM budget guard (only raise the scoped limit when actually needed;
    # cap at 64 MiB so the same value is legal on v5e/v6e/v7x).
    wbytes = (wce.size * wce.dtype.itemsize + wfc2.size * wfc2.dtype.itemsize)
    est = (2 * tb * L * 4           # double-buffered input blocks
           + 2 * tb * L * 4         # double-buffered output blocks
           + 2 * wbytes             # weights (worst case double-buffered)
           + 2 * (CL + L) * 4       # bias rows
           + 2 * tb * CL * 4)       # conv/fc intermediates
    vlim = None
    if est > 12 * 1024 * 1024:
        vlim = int(min(64 * 1024 * 1024, 2 * est))

    out = pl.pallas_call(
        _cnn_kernel,
        out_shape=jax.ShapeDtypeStruct((Bp, L), jnp.float32),
        grid=grid,
        in_specs=[
            pl.BlockSpec((tb, L), lambda i: (i, 0)),     # x block
            pl.BlockSpec((L, CL), lambda i: (0, 0)),     # conv matrix (resident)
            pl.BlockSpec((1, CL), lambda i: (0, 0)),     # conv bias row
            pl.BlockSpec((CL, L), lambda i: (0, 0)),     # fc weight (resident)
            pl.BlockSpec((1, L), lambda i: (0, 0)),      # fc bias row
        ],
        out_specs=pl.BlockSpec((tb, L), lambda i: (i, 0)),
        compiler_params=pltpu.CompilerParams(
            dimension_semantics=("parallel",),           # v7x megacore sharding
            vmem_limit_bytes=vlim),
    )(x2, wce, bconv_row, wfc2, bfc_row)

    if Bp != B:
        out = out[:B]
    return out[..., None]                                # unsqueeze(-1)


def _reference(x, params):
    """Pure-JAX reference mirroring the PyTorch forward exactly (f32)."""
    wconv, bconv, wfc, bfc = params
    B, L, _ = x.shape
    C, _, K = wconv.shape
    xt = jnp.transpose(x, (0, 2, 1))                     # (B, 1, L)
    xpad = jnp.pad(xt, ((0, 0), (0, 0), (1, 1)))         # (B, 1, L+2)
    conv = jnp.stack(
        [sum(wconv[c, 0, k] * xpad[:, 0, k:k + L] for k in range(K)) + bconv[c]
         for c in range(C)],
        axis=1)                                          # (B, C, L)
    h = jnp.maximum(conv, 0.0).reshape(B, C * L)
    out = h @ wfc.T + bfc                                # (B, L)
    return out[..., None]


def init_params(key, input_size, out_channels=16, kernel_size=3):
    k1, k2, k3, k4 = jax.random.split(key, 4)
    wconv = 0.2 * jax.random.normal(k1, (out_channels, 1, kernel_size), jnp.float32)
    bconv = 0.1 * jax.random.normal(k2, (out_channels,), jnp.float32)
    wfc = 0.05 * jax.random.normal(k3, (input_size, out_channels * input_size), jnp.float32)
    bfc = 0.1 * jax.random.normal(k4, (input_size,), jnp.float32)
    return wconv, bconv, wfc, bfc


if __name__ == "__main__":
    B = 2
    input_size = 16          # L
    out_channels = 16        # C
    kernel_size = 3          # K

    key = jax.random.PRNGKey(0)
    kx, kp = jax.random.split(key)
    x = jax.random.normal(kx, (B, input_size, 1), jnp.float32)
    params = init_params(kp, input_size, out_channels, kernel_size)
    y_ref = _reference(x, params)

    # --- f32 compute path: tight check against the PyTorch-equivalent reference ---
    packed_f32 = pack_params(params, compute_dtype=jnp.float32)
    y32 = jax.block_until_ready(cnn_model_forward(x, packed_f32))
    assert y32.shape == (B, input_size, 1)
    assert jnp.allclose(y32, y_ref, rtol=1e-4, atol=1e-4), "f32 mismatch vs reference"

    # --- bf16 MXU fast path (f32 accumulation): looser tolerance ---
    packed_bf16 = pack_params(params, compute_dtype=jnp.bfloat16)
    y16 = jax.block_until_ready(cnn_model_forward(x, packed_bf16))
    assert jnp.allclose(y16, y_ref, rtol=3e-2, atol=3e-2), "bf16 mismatch vs reference"

    # --- multi-step grid + batch-remainder path (tb=8, B=20 -> grid=(3,), pad=4) ---
    xb = jax.random.normal(jax.random.PRNGKey(1), (20, input_size, 1), jnp.float32)
    yb = jax.block_until_ready(cnn_model_forward(xb, packed_f32, batch_tile=8))
    assert yb.shape == (20, input_size, 1)
    assert jnp.allclose(yb, _reference(xb, params), rtol=1e-4, atol=1e-4), \
        "tiled-batch mismatch vs reference"

    print("KERNEL_OK")
</pallas_src>

<mosaic_0001>
module attributes {stable_mosaic.version = 11 : i64} {
  func.func @_cnn_kernel(%arg0: i32, %arg1: memref<2x16xf32, #tpu.memory_space<vmem>>, %arg2: memref<16x256xf32, #tpu.memory_space<vmem>>, %arg3: memref<1x256xf32, #tpu.memory_space<vmem>>, %arg4: memref<256x16xf32, #tpu.memory_space<vmem>>, %arg5: memref<1x16xf32, #tpu.memory_space<vmem>>, %arg6: memref<2x16xf32, #tpu.memory_space<vmem>>) attributes {dimension_semantics = [#tpu.dimension_semantics<parallel>], iteration_bounds = array<i64: 1>, scalar_prefetch = 0 : i64, scratch_operands = 0 : i64, tpu.core_type = #tpu.core_type<tc>, window_params = [{transform_indices = @transform_0, window_bounds = array<i64: 2, 16>}, {pipeline_mode = #tpu.pipeline_mode<synchronous>, transform_indices = @transform_1, window_bounds = array<i64: 16, 256>}, {pipeline_mode = #tpu.pipeline_mode<synchronous>, transform_indices = @transform_2, window_bounds = array<i64: 1, 256>}, {pipeline_mode = #tpu.pipeline_mode<synchronous>, transform_indices = @transform_3, window_bounds = array<i64: 256, 16>}, {pipeline_mode = #tpu.pipeline_mode<synchronous>, transform_indices = @transform_4, window_bounds = array<i64: 1, 16>}, {transform_indices = @transform_5, window_bounds = array<i64: 2, 16>}]} {
    %c0 = arith.constant 0 : index
    %c0_0 = arith.constant 0 : index
    %0 = vector.load %arg1[%c0, %c0_0] : memref<2x16xf32, #tpu.memory_space<vmem>>, vector<2x16xf32>
    %c0_1 = arith.constant 0 : index
    %c0_2 = arith.constant 0 : index
    %1 = vector.load %arg2[%c0_1, %c0_2] : memref<16x256xf32, #tpu.memory_space<vmem>>, vector<16x256xf32>
    %cst = arith.constant dense<0.000000e+00> : vector<2x256xf32>
    %2 = tpu.matmul %0, %1, %cst {dimension_numbers = #tpu.dot_dimension_numbers<[1], [0], [0], [1], [0, 0, 1, 1], [], []>} : vector<2x16xf32>, vector<16x256xf32>, vector<2x256xf32> -> vector<2x256xf32>
    %c0_3 = arith.constant 0 : index
    %c0_4 = arith.constant 0 : index
    %3 = vector.load %arg3[%c0_3, %c0_4] : memref<1x256xf32, #tpu.memory_space<vmem>>, vector<1x256xf32>
    %4 = vector.broadcast %3 : vector<1x256xf32> to vector<2x256xf32>
    %5 = arith.addf %2, %4 : vector<2x256xf32>
    %cst_5 = arith.constant 0.000000e+00 : f32
    %6 = vector.broadcast %cst_5 : f32 to vector<2x256xf32>
    %7 = arith.maximumf %5, %6 : vector<2x256xf32>
    %c0_6 = arith.constant 0 : index
    %c0_7 = arith.constant 0 : index
    %8 = vector.load %arg4[%c0_6, %c0_7] : memref<256x16xf32, #tpu.memory_space<vmem>>, vector<256x16xf32>
    %cst_8 = arith.constant dense<0.000000e+00> : vector<2x16xf32>
    %9 = tpu.matmul %7, %8, %cst_8 {dimension_numbers = #tpu.dot_dimension_numbers<[1], [0], [0], [1], [0, 0, 1, 1], [], []>} : vector<2x256xf32>, vector<256x16xf32>, vector<2x16xf32> -> vector<2x16xf32>
    %c0_9 = arith.constant 0 : index
    %c0_10 = arith.constant 0 : index
    %10 = vector.load %arg5[%c0_9, %c0_10] : memref<1x16xf32, #tpu.memory_space<vmem>>, vector<1x16xf32>
    %11 = vector.broadcast %10 : vector<1x16xf32> to vector<2x16xf32>
    %12 = arith.addf %9, %11 : vector<2x16xf32>
    %c0_11 = arith.constant 0 : index
    %c0_12 = arith.constant 0 : index
    %13 = vector.load %arg6[%c0_11, %c0_12] : memref<2x16xf32, #tpu.memory_space<vmem>>, vector<2x16xf32>
    tpu.vector_store %arg6[%c0_11, %c0_12], %12 {strides = array<i32>} : memref<2x16xf32, #tpu.memory_space<vmem>>, vector<2x16xf32>,
    return
  }
  func.func @transform_0(%arg0: i32) -> (i32, i32) {
    %c0_i32 = arith.constant 0 : i32
    %c0_i32_0 = arith.constant 0 : i32
    return %arg0, %c0_i32 : i32, i32
  }
  func.func @transform_1(%arg0: i32) -> (i32, i32) {
    %c0_i32 = arith.constant 0 : i32
    %c0_i32_0 = arith.constant 0 : i32
    %c0_i32_1 = arith.constant 0 : i32
    return %c0_i32, %c0_i32_0 : i32, i32
  }
  func.func @transform_2(%arg0: i32) -> (i32, i32) {
    %c0_i32 = arith.constant 0 : i32
    %c0_i32_0 = arith.constant 0 : i32
    %c0_i32_1 = arith.constant 0 : i32
    return %c0_i32, %c0_i32_0 : i32, i32
  }
  func.func @transform_3(%arg0: i32) -> (i32, i32) {
    %c0_i32 = arith.constant 0 : i32
    %c0_i32_0 = arith.constant 0 : i32
    %c0_i32_1 = arith.constant 0 : i32
    return %c0_i32, %c0_i32_0 : i32, i32
  }
  func.func @transform_4(%arg0: i32) -> (i32, i32) {
    %c0_i32 = arith.constant 0 : i32
    %c0_i32_0 = arith.constant 0 : i32
    %c0_i32_1 = arith.constant 0 : i32
    return %c0_i32, %c0_i32_0 : i32, i32
  }
  func.func @transform_5(%arg0: i32) -> (i32, i32) {
    %c0_i32 = arith.constant 0 : i32
    %c0_i32_0 = arith.constant 0 : i32
    return %arg0, %c0_i32 : i32, i32
  }
}

</mosaic_0001>

<bundles_post_ra>
// kernel: tpu_custom_call.1
= control target key start
LH: loop header
LB: loop body
LE: loop exit
PB: predicated region body
PF: predicated region fallthrough
CT: control target
= control target key end

     0   :  { %v339_v5 = vmov 0.0   ;;  %vm38_vm0 = vcmask 130048   ;;  %s500_s0 = inlined_call_operand.vmem [shape: f32[2,16], index: 0, kind: input, shape index: {}]   ;;  %s501_s1 = inlined_call_operand.vmem [shape: f32[16,256], index: 1, kind: input, shape index: {}]   ;;  %s502_s2 = inlined_call_operand.vmem [shape: f32[1,256], index: 2, kind: input, shape index: {}]   ;;  %s503_s3 = inlined_call_operand.vmem [shape: f32[256,16], index: 3, kind: input, shape index: {}]   ;;  %s504_s4 = inlined_call_operand.vmem [shape: f32[1,16], index: 4, kind: input, shape index: {}]   ;;  %s505_s5 = inlined_call_operand.hbm [shape: f32[2,16], index: 5, kind: output, shape index: {}]  }
   0x1   :  { %v23_v0 = vld [vmem:[%s501_s1 + $0x8] sm:$0xff]  ;;  %v25_v1 = vld [vmem:[%s501_s1 + $0x18] sm:$0xff]  ;;  %v22_v2 = vld [vmem:[%s501_s1] sm:$0xff]  ;;  %106 = vmatprep.mubr.f32.mxu0 %v339_v5 }
   0x2   :  { %v277_v3 = vpack.c.bf16 %v25_v1, %v23_v0  ;;  %v24_v4 = vld [vmem:[%s501_s1 + $0x10] sm:$0xff]  ;;  %v131_v6 = vld [vmem:[%s503_s3 + $0x80] sm:$0xff]  ;;  %v132_v9 = vld [vmem:[%s503_s3 + $0x88] sm:$0xff] }
   0x3   :  { %v279_v7 = vpack.c.bf16 %v24_v4, %v22_v2  ;;  %v21_v8 = vld [vmem:[%s500_s0] sm:$0x3]  ;;  %v116_v11 = vld [vmem:[%s503_s3 + $0x8] sm:$0xff]  ;;  %v281_v12 = vpack.c.bf16 %v132_v9, %v131_v6  ;;  %v133_v14 = vld [vmem:[%s503_s3 + $0x90] sm:$0xff] }
   0x4   :  { %v115_v10 = vld [vmem:[%s503_s3] sm:$0xff]  ;;  %278 = vmatprep.subr.bf16.mxu0 %v277_v3  ;;  %v134_v15 = vld [vmem:[%s503_s3 + $0x98] sm:$0xff]  ;;  %v117_v16 = vld [vmem:[%s503_s3 + $0x10] sm:$0xff] }
   0x5   :  { %v283_v13 = vpack.c.bf16 %v116_v11, %v115_v10  ;;  %280 = vmatpush1.bf16.msra.mxu0 %v279_v7  ;;  %v285_v17 = vpack.c.bf16 %v134_v15, %v133_v14  ;;  %v118_v18 = vld [vmem:[%s503_s3 + $0x18] sm:$0xff]  ;;  %v135_v19 = vld [vmem:[%s503_s3 + $0xa0] sm:$0xff]  ;;  %v136_v20 = vld [vmem:[%s503_s3 + $0xa8] sm:$0xff]  ;;  %282 = vmatprep.subr.bf16.mxu1 %v281_v12 }
   0x6   :  { %v287_v21 = vpack.c.bf16 %v118_v18, %v117_v16  ;;  %v289_v22 = vpack.c.bf16 %v136_v20, %v135_v19  ;;  %v119_v23 = vld [vmem:[%s503_s3 + $0x20] sm:$0xff]  ;;  %v120_v24 = vld [vmem:[%s503_s3 + $0x28] sm:$0xff]  ;;  %v137_v25 = vld [vmem:[%s503_s3 + $0xb0] sm:$0xff] }
   0x7   :  { %284 = vmatpush3.bf16.msra.mxu1 %v283_v13  ;;  %v138_v26 = vld [vmem:[%s503_s3 + $0xb8] sm:$0xff]  ;;  %v291_v27 = vpack.c.bf16 %v120_v24, %v119_v23 }
   0x8   :  { %240 = vmatmul.mubr.msk.f32.vlgmr.msra.gmra.mrb[0].mxu0 %vm38_vm0, %v21_v8  ;;  %286 = vmatprep.subr.bf16.mxu1 %v285_v17 }
   0xb   :  { %288 = vmatpush3.bf16.msra.mxu1 %v287_v21 }
   0xc   :  { %10 = vsyncpa [#allocation3], 0  ;;  %290 = vmatprep.subr.bf16.mxu1 %v289_v22  ;;  %v293_v28 = vpack.c.bf16 %v138_v26, %v137_v25  ;;  %v121_v29 = vld [vmem:[%s503_s3 + $0x30] sm:$0xff]  ;;  %v122_v30 = vld [vmem:[%s503_s3 + $0x38] sm:$0xff]  ;;  %v28_v56 = vlaneseq  ;;  %s340_s14 = smov [#allocation2]   ;;  %vm224_vm1 = vcmask 123904  }
   0xd   :  { %v139_v31 = vld [vmem:[%s503_s3 + $0xc0] sm:$0xff]  ;;  %v140_v32 = vld [vmem:[%s503_s3 + $0xc8] sm:$0xff]  ;;  %v295_v33 = vpack.c.bf16 %v122_v30, %v121_v29  ;;  %v141_v37 = vld [vmem:[%s503_s3 + $0xd0] sm:$0xff]  ;;  %s232_s15 = sshll.u32 %s340_s14, 4  ;;  %s233_s15 = int_to_ptr.vmem [resolvable:$true] %s232_s15 }
   0xe   :  { %v297_v34 = vpack.c.bf16 %v140_v32, %v139_v31  ;;  %v123_v35 = vld [vmem:[%s503_s3 + $0x40] sm:$0xff]  ;;  %v124_v36 = vld [vmem:[%s503_s3 + $0x48] sm:$0xff]  ;;  %v142_v38 = vld [vmem:[%s503_s3 + $0xd8] sm:$0xff]  ;;  %v29_v57 = vshrl.u32 %v28_v56, 7  ;;  %p320_p1 = scmp.lt.s32.totalorder %s233_s15, %s233_s15 }
   0xf   :  { %292 = vmatpush3.bf16.msra.mxu1 %v291_v27  ;;  %v299_v39 = vpack.c.bf16 %v124_v36, %v123_v35  ;;  %v301_v40 = vpack.c.bf16 %v142_v38, %v141_v37  ;;  %v125_v41 = vld [vmem:[%s503_s3 + $0x50] sm:$0xff]  ;;  %v126_v42 = vld [vmem:[%s503_s3 + $0x58] sm:$0xff]  ;;  %v143_v43 = vld [vmem:[%s503_s3 + $0xe0] sm:$0xff] }
  0x10   :  { %294 = vmatprep.subr.bf16.mxu1 %v293_v28  ;;  %v144_v44 = vld [vmem:[%s503_s3 + $0xe8] sm:$0xff]  ;;  %v303_v45 = vpack.c.bf16 %v126_v42, %v125_v41  ;;  %v127_v47 = vld [vmem:[%s503_s3 + $0x60] sm:$0xff]  ;;  %v145_v50 = vld [vmem:[%s503_s3 + $0xf0] sm:$0xff]  ;;  %v30_v58 = vsub.s32 0, %v29_v57  ;;  %v34_v60 = vsub.s32 1, %v29_v57 }
  0x11   :  { %v305_v46 = vpack.c.bf16 %v144_v44, %v143_v43  ;;  %v128_v48 = vld [vmem:[%s503_s3 + $0x68] sm:$0xff]  ;;  %v146_v51 = vld [vmem:[%s503_s3 + $0xf8] sm:$0xff]  ;;  %v129_v53 = vld [vmem:[%s503_s3 + $0x70] sm:$0xff] }
  0x12   :  { %v307_v49 = vpack.c.bf16 %v128_v48, %v127_v47  ;;  %v309_v52 = vpack.c.bf16 %v146_v51, %v145_v50  ;;  %v130_v54 = vld [vmem:[%s503_s3 + $0x78] sm:$0xff]  ;;  %v26_v59 = vld [vmem:[%s502_s2] sm:$0x3]  ;;  %s315_s2 = scalar_lea.vmem %s233_s15, 32 }
  0x13   :  { %296 = vmatpush3.bf16.msra.mxu1 %v295_v33  ;;  %v311_v55 = vpack.c.bf16 %v130_v54, %v129_v53  ;;  %v31_v61 = vrot.slane %v26_v59, %v30_v58  ;;  %v35_v62 = vrot.slane %v26_v59, %v34_v60  ;;  %v241_v6 = vld [vmem:[%s504_s4] ss:$0 sm:$0xff]  ;;  %p316_p0 = scmp.ne.s32.totalorder %s233_s15, %s315_s2  ;;  %p321_p2 = scmp.lt.s32.totalorder %s315_s2, %s315_s2 }
  0x14   :  { %298 = vmatprep.subr.bf16.mxu1 %v297_v34 }
  0x15   :  { %p322_p3 = por %p321_p2, %p320_p1 }
  0x17   :  { %300 = vmatpush3.bf16.msra.mxu1 %v299_v39  ;;  %p323_p4 = pnand %p322_p3, %p316_p0 }
  0x18   :  { %302 = vmatprep.subr.bf16.mxu1 %v301_v40 }
  0x1b   :  { %304 = vmatpush3.bf16.msra.mxu1 %v303_v45 }
  0x1c   :  { %306 = vmatprep.subr.bf16.mxu1 %v305_v46 }
  0x1f   :  { %308 = vmatpush3.bf16.msra.mxu1 %v307_v49 }
  0x20   :  { %310 = vmatprep.subr.bf16.mxu1 %v309_v52 }
  0x23   :  { %312 = vmatpush3.bf16.msra.mxu1 %v311_v55 }
  0xdb   :  { %v108_v63 = vpop.f32.mrb[0].mxu0 }
  0xdc   :  { %v109_v0 = vadd.f32 %v108_v63, %v31_v61  ;;  %v110_v1 = vpop.f32.mrb[1].mxu0 }
  0xdd   :  { %v111_v2 = vadd.f32 %v110_v1, %v35_v62 }
  0xde   :  { %v113_v4 = vmax.f32 %v109_v0, 0.0 }
  0xdf   :  { %v114_v3 = vmax.f32 %v111_v2, 0.0 }
  0xe1   :  { %218 = vmatprep.mubr.f32.mxu1 %v114_v3 }
  0xe2   :  { %219 = vmatmul.mubr.f32.vlgmr.msra.gmra.mrb[0].mxu1 %v113_v4 }
 0x1b5   :  { %v274_v5 = vpop.f32.mrb[0].mxu1 }
 0x1b6   :  { %v275_v7 = vpop.f32.mrb[1].mxu1 }
 0x1b7   :  { %v276_v8 = vadd.f32 %v275_v7, %v274_v5 }
 0x1b9   :  { %v221_v9 = vadd.f32 %v276_v8, %v241_v6 }
 0x1bb   :  { %225 = vst.msk [vmem:[#allocation2] sm:$0x3] %vm224_vm1, %v221_v9 }
 0x1bc   :  { %326 = shalt.err (!%p323_p4)
}
 0x1bd   :  { %s327_s18 = scalar_lea.hbm %s505_s5, 32 }
 0x1be   :  { %p328_p5 = scmp.ne.s32.totalorder %s505_s5, %s327_s18  ;;  %p331_p6 = scmp.lt.u32.totalorder %s327_s18, %s505_s5 }
 0x1c0   :  { %p333_p7 = pnand %p331_p6, %p328_p5 }
 0x1c2   :  { %336 = shalt.err (!%p333_p7)
}
 0x1c3   :  { %235 = dma.vmem_to_hbm [thread:$0]  %s233_s15, 32, %s505_s5, [#allocation3]  }
 0x1c4   :  { %337 = dma.done.wait [#allocation3], 32  }
 0x1c5   :  { %338 = vsyncadd [#allocation3], 4294967264 }
 0x1c6   :  { %239 = vsyncpa [#allocation3], 1 }

</bundles_post_ra>
